<compile_context>
chip_gen: v5e
topology: v5e:2x2
jax: 0.10.0
libtpu: 0.0.40
codegen_flags: <defaults>
</compile_context>

<pallas_src>
import functools

import jax
import jax.numpy as jnp
from jax.experimental import pallas as pl
from jax.experimental.pallas import tpu as pltpu


def _convblock_kernel(pt_ref, w_ref, scale_ref, bias_ref, o_ref):
    # pt_ref:    (K_pad, M_pad)      bf16 transposed im2col patches (one sample)
    # w_ref:     (C_out_pad, K_pad)  bf16 reshaped conv weight
    # scale_ref: (C_out_pad, 1)      f32 folded BN scale
    # bias_ref:  (C_out_pad, 1)      f32 folded BN bias
    # o_ref:     (C_out_pad, M_pad)  f32 output, lane-dense (M_pad % 128 == 0)
    acc = jnp.dot(w_ref[...], pt_ref[...], preferred_element_type=jnp.float32)
    y = acc * scale_ref[...] + bias_ref[...]
    o_ref[...] = jnp.maximum(y, 0.0).astype(o_ref.dtype)


def _round_up(v, m):
    return ((v + m - 1) // m) * m


def _im2col_t(x_nchw, kh, kw, k_pad, m_pad):
    """x: [N, C, H, W] -> transposed patches [N, K_pad, M_pad] (stride 1, VALID).

    K ordering is c*KH*KW + i*KW + j, matching w.reshape(C_out, C*KH*KW).
    Padded K rows / M columns are zero.
    """
    n, c, h, w = x_nchw.shape
    oh, ow = h - kh + 1, w - kw + 1
    slabs = []
    for i in range(kh):
        for j in range(kw):
            slabs.append(x_nchw[:, :, i:i + oh, j:j + ow])  # [N, C, OH, OW]
    p = jnp.stack(slabs, axis=2)                 # [N, C, KH*KW, OH, OW]
    p = p.reshape(n, c * kh * kw, oh * ow)       # [N, K, M]
    p = jnp.pad(p, ((0, 0), (0, k_pad - c * kh * kw), (0, m_pad - oh * ow)))
    return p, (oh, ow)


@functools.partial(jax.jit, static_argnames=("kernel_size",))
def conv_block_forward(x, w, gamma, beta, running_mean, running_var,
                       kernel_size, eps=1e-5):
    """ConvBlock forward: ReLU(BN_eval(Conv2d(x, w))), NCHW in / NCHW out."""
    c_out, c_in, kh, kw = w.shape
    assert kh == kernel_size and kw == kernel_size

    n, _, h, w_in = x.shape
    oh, ow = h - kh + 1, w_in - kw + 1
    k = c_in * kh * kw
    m = oh * ow

    k_pad = _round_up(k, 8)           # sublane-aligned contraction dim
    m_pad = _round_up(m, 128)         # lane-aligned spatial dim (lane-dense vst)
    c_out_pad = _round_up(c_out, 8)   # sublane-aligned output channels

    # Transposed im2col patches; bf16 operands, f32 accumulation in the kernel.
    pt, _ = _im2col_t(x, kh, kw, k_pad, m_pad)
    pt = pt.astype(jnp.bfloat16)                              # [N, K_pad, M_pad]

    wmat = w.reshape(c_out, k)
    wmat = jnp.pad(wmat, ((0, c_out_pad - c_out), (0, k_pad - k)))
    wmat = wmat.astype(jnp.bfloat16)                          # [C_out_pad, K_pad]

    scale = gamma / jnp.sqrt(running_var + eps)
    bias = beta - running_mean * scale
    scale = jnp.pad(scale, (0, c_out_pad - c_out)).reshape(c_out_pad, 1)
    bias = jnp.pad(bias, (0, c_out_pad - c_out)).reshape(c_out_pad, 1)
    scale = scale.astype(jnp.float32)
    bias = bias.astype(jnp.float32)

    # One grid step per sample: >=2 "parallel" blocks keeps both v7x TCs busy
    # while per-step overhead stays negligible. The per-sample working set
    # (bf16 patches tile + f32 output slab) is a few tens of KiB, far below
    # VMEM limits on v5e/v6e (128 MiB) and v7x (64 MiB); re-derive the tiling
    # (split M_pad / add a K loop) before scaling to large H/W.
    out_pad = pl.pallas_call(
        _convblock_kernel,
        out_shape=jax.ShapeDtypeStruct((n, c_out_pad, m_pad), x.dtype),
        grid_spec=pltpu.PrefetchScalarGridSpec(
            num_scalar_prefetch=0,
            grid=(n,),
            in_specs=[
                pl.BlockSpec((None, k_pad, m_pad), lambda i: (i, 0, 0)),
                pl.BlockSpec((c_out_pad, k_pad), lambda i: (0, 0)),
                pl.BlockSpec((c_out_pad, 1), lambda i: (0, 0)),
                pl.BlockSpec((c_out_pad, 1), lambda i: (0, 0)),
            ],
            out_specs=pl.BlockSpec((None, c_out_pad, m_pad),
                                   lambda i: (i, 0, 0)),
        ),
        compiler_params=pltpu.CompilerParams(
            dimension_semantics=("parallel",)),
    )(pt, wmat, scale, bias)

    # Kernel already emits NCHW-ordered data: drop padding and reshape only
    # (no post-kernel transpose).
    out = out_pad[:, :c_out, :m].reshape(n, c_out, oh, ow)
    return out


def _reference(x, w, gamma, beta, running_mean, running_var, eps=1e-5):
    y = jax.lax.conv_general_dilated(
        x, w, window_strides=(1, 1), padding="VALID",
        dimension_numbers=("NCHW", "OIHW", "NCHW"))
    scale = gamma / jnp.sqrt(running_var + eps)
    bias = beta - running_mean * scale
    y = y * scale[None, :, None, None] + bias[None, :, None, None]
    return jnp.maximum(y, 0.0)


if __name__ == "__main__":
    # Small shapes consistent with the module: ConvBlock(4, 8, 3)
    N, C_IN, H, W = 2, 4, 16, 16
    C_OUT, KS = 8, 3

    key = jax.random.PRNGKey(0)
    kx, kw, kg, kb, km, kv = jax.random.split(key, 6)

    x = jax.random.normal(kx, (N, C_IN, H, W), dtype=jnp.float32)
    w = jax.random.normal(kw, (C_OUT, C_IN, KS, KS), dtype=jnp.float32) * 0.1
    gamma = 1.0 + 0.1 * jax.random.normal(kg, (C_OUT,), dtype=jnp.float32)
    beta = 0.1 * jax.random.normal(kb, (C_OUT,), dtype=jnp.float32)
    running_mean = 0.1 * jax.random.normal(km, (C_OUT,), dtype=jnp.float32)
    running_var = jnp.abs(1.0 + 0.1 * jax.random.normal(kv, (C_OUT,),
                                                        dtype=jnp.float32))

    out = conv_block_forward(x, w, gamma, beta, running_mean, running_var,
                             kernel_size=KS)
    out = jax.block_until_ready(out)

    ref = _reference(x, w, gamma, beta, running_mean, running_var)
    assert out.shape == (N, C_OUT, H - KS + 1, W - KS + 1)
    # bf16 matmul operands with f32 accumulation -> looser tolerance than pure f32.
    assert jnp.allclose(out, ref, rtol=5e-2, atol=5e-2), (
        "max abs err = %f" % float(jnp.max(jnp.abs(out - ref))))

    print("KERNEL_OK")
</pallas_src>

<mosaic_0001>
module attributes {stable_mosaic.version = 11 : i64} {
  func.func @_convblock_kernel(%arg0: i32, %arg1: memref<1x40x256xbf16, #tpu.memory_space<vmem>>, %arg2: memref<8x40xbf16, #tpu.memory_space<vmem>>, %arg3: memref<8x1xf32, #tpu.memory_space<vmem>>, %arg4: memref<8x1xf32, #tpu.memory_space<vmem>>, %arg5: memref<1x8x256xf32, #tpu.memory_space<vmem>>) attributes {dimension_semantics = [#tpu.dimension_semantics<parallel>], iteration_bounds = array<i64: 2>, scalar_prefetch = 0 : i64, scratch_operands = 0 : i64, tpu.core_type = #tpu.core_type<tc>, window_params = [{transform_indices = @transform_0, window_bounds = array<i64: 1, 40, 256>}, {pipeline_mode = #tpu.pipeline_mode<synchronous>, transform_indices = @transform_1, window_bounds = array<i64: 8, 40>}, {pipeline_mode = #tpu.pipeline_mode<synchronous>, transform_indices = @transform_2, window_bounds = array<i64: 8, 1>}, {pipeline_mode = #tpu.pipeline_mode<synchronous>, transform_indices = @transform_3, window_bounds = array<i64: 8, 1>}, {transform_indices = @transform_4, window_bounds = array<i64: 1, 8, 256>}]} {
    %c0 = arith.constant 0 : index
    %c0_0 = arith.constant 0 : index
    %0 = vector.load %arg2[%c0, %c0_0] : memref<8x40xbf16, #tpu.memory_space<vmem>>, vector<8x40xbf16>
    %c0_1 = arith.constant 0 : index
    %c0_2 = arith.constant 0 : index
    %c0_3 = arith.constant 0 : index
    %1 = vector.load %arg1[%c0_1, %c0_2, %c0_3] : memref<1x40x256xbf16, #tpu.memory_space<vmem>>, vector<1x40x256xbf16>
    %2 = vector.shape_cast %1 : vector<1x40x256xbf16> to vector<40x256xbf16>
    %cst = arith.constant dense<0.000000e+00> : vector<8x256xf32>
    %3 = tpu.matmul %0, %2, %cst {dimension_numbers = #tpu.dot_dimension_numbers<[1], [0], [0], [1], [0, 0, 1, 1], [], []>} : vector<8x40xbf16>, vector<40x256xbf16>, vector<8x256xf32> -> vector<8x256xf32>
    %c0_4 = arith.constant 0 : index
    %c0_5 = arith.constant 0 : index
    %4 = vector.load %arg3[%c0_4, %c0_5] : memref<8x1xf32, #tpu.memory_space<vmem>>, vector<8x1xf32>
    %5 = vector.broadcast %4 : vector<8x1xf32> to vector<8x256xf32>
    %6 = arith.mulf %3, %5 : vector<8x256xf32>
    %c0_6 = arith.constant 0 : index
    %c0_7 = arith.constant 0 : index
    %7 = vector.load %arg4[%c0_6, %c0_7] : memref<8x1xf32, #tpu.memory_space<vmem>>, vector<8x1xf32>
    %8 = vector.broadcast %7 : vector<8x1xf32> to vector<8x256xf32>
    %9 = arith.addf %6, %8 : vector<8x256xf32>
    %cst_8 = arith.constant 0.000000e+00 : f32
    %10 = vector.broadcast %cst_8 : f32 to vector<8x256xf32>
    %11 = arith.maximumf %9, %10 : vector<8x256xf32>
    %c0_9 = arith.constant 0 : index
    %c0_10 = arith.constant 0 : index
    %c0_11 = arith.constant 0 : index
    %12 = vector.load %arg5[%c0_9, %c0_10, %c0_11] : memref<1x8x256xf32, #tpu.memory_space<vmem>>, vector<1x8x256xf32>
    %13 = vector.shape_cast %12 : vector<1x8x256xf32> to vector<8x256xf32>
    %14 = vector.shape_cast %11 : vector<8x256xf32> to vector<1x8x256xf32>
    tpu.vector_store %arg5[%c0_9, %c0_10, %c0_11], %14 {strides = array<i32>} : memref<1x8x256xf32, #tpu.memory_space<vmem>>, vector<1x8x256xf32>,
    return
  }
  func.func @transform_0(%arg0: i32) -> (i32, i32, i32) {
    %c0_i32 = arith.constant 0 : i32
    %c0_i32_0 = arith.constant 0 : i32
    %c0_i32_1 = arith.constant 0 : i32
    return %arg0, %c0_i32, %c0_i32_0 : i32, i32, i32
  }
  func.func @transform_1(%arg0: i32) -> (i32, i32) {
    %c0_i32 = arith.constant 0 : i32
    %c0_i32_0 = arith.constant 0 : i32
    %c0_i32_1 = arith.constant 0 : i32
    return %c0_i32, %c0_i32_0 : i32, i32
  }
  func.func @transform_2(%arg0: i32) -> (i32, i32) {
    %c0_i32 = arith.constant 0 : i32
    %c0_i32_0 = arith.constant 0 : i32
    %c0_i32_1 = arith.constant 0 : i32
    return %c0_i32, %c0_i32_0 : i32, i32
  }
  func.func @transform_3(%arg0: i32) -> (i32, i32) {
    %c0_i32 = arith.constant 0 : i32
    %c0_i32_0 = arith.constant 0 : i32
    %c0_i32_1 = arith.constant 0 : i32
    return %c0_i32, %c0_i32_0 : i32, i32
  }
  func.func @transform_4(%arg0: i32) -> (i32, i32, i32) {
    %c0_i32 = arith.constant 0 : i32
    %c0_i32_0 = arith.constant 0 : i32
    %c0_i32_1 = arith.constant 0 : i32
    return %arg0, %c0_i32, %c0_i32_0 : i32, i32, i32
  }
}

</mosaic_0001>

<bundles_post_ra>
// kernel: conv_block_forward.1
= control target key start
LH: loop header
LB: loop body
LE: loop exit
PB: predicated region body
PF: predicated region fallthrough
CT: control target
= control target key end

     0   :  { %s420_s15 = smov 0   ;;  %s450_s0 = inlined_call_operand.vmem [shape: bf16[2,40,256], index: 0, kind: input, shape index: {}]   ;;  %s451_s1 = inlined_call_operand.vmem [shape: bf16[8,40], index: 1, kind: input, shape index: {}]   ;;  %s452_s2 = inlined_call_operand.vmem [shape: f32[8,1], index: 2, kind: input, shape index: {}]   ;;  %s453_s3 = inlined_call_operand.vmem [shape: f32[8,1], index: 3, kind: input, shape index: {}]   ;;  %s454_s4 = inlined_call_operand.vmem [shape: f32[2,8,256], index: 4, kind: output, shape index: {}]  }
   0x1 LB: > { %s342_s16 = sadd.s32 4294967295, %s392_s15   ;;  %p346_p0 = scmp.ge.s32.totalorder %s392_s15, 1  ;;  %s392_s15 = sphi %s420_s15, %s14_s15  }
   0x2   : > { %p162_p1 = scmp.lt.s32.totalorder %s392_s15, 3 }
   0x4   : > { %p163_p2 = pnand %p346_p0, %p162_p1 }
   0x5   : > { %p188_p3 = scmp.lt.s32.totalorder (!%p163_p2), %s342_s16, 1 }
   0x6   : > { %166 = sbr.rel (%p163_p2) target bundleno = 167 (0xa7), region = 36 }
   0xb   : > { %v267_v0 = vld [vmem:[%s452_s2] sm:$0xff]  ;;  %v394_v1 = vmov 0   ;;  %s456_s16 = smov (!%p188_p3, %s342_s16), 1  ;;  %vm234_vm0 = vcmask 1043456   ;;  %vm230_vm1 = vcmask 326656  }
   0xc   : > { %385 = vset.pattern.permute.xlu0 %v394_v1  ;;  %s375_s19 = smul.u32 40, %s456_s16  ;;  %v275_v3 = vld [vmem:[%s453_s3] sm:$0xff]  ;;  %s370_s27 = sshll.u32 %s456_s16, 4 }
   0xd   : > { %270 = vperm.xlu0 %385, %v267_v0   ;;  %v199_v22 = vld [vmem:[%s451_s1] sm:$0xf]  ;;  %s197_s30 = scalar_lea.vmem %s454_s4, %s370_s27 }
   0xe   : > { %s192_s22 = scalar_lea.vmem %s450_s0, %s375_s19 }
   0xf   : > { %v204_v2 = vld [vmem:[%s192_s22 + $0x20] sm:$0xff]  ;;  %v360_v6 = vld [vmem:[%s192_s22 + $0x10] sm:$0xf]  ;;  %v374_v9 = vld [vmem:[%s192_s22 + $0x14] sm:$0xf0] }
  0x10   : > { %v218_v4 = vunpack.c.l.b16 %v204_v2  ;;  %v219_v5 = vunpack.c.h.b16 %v204_v2  ;;  %v373_v10 = vld [vmem:[%s192_s22 + $0x14] sm:$0xf]  ;;  %v362_v11 = vld [vmem:[%s192_s22 + $0x18] sm:$0xf0]  ;;  %v361_v14 = vor.u32 %v374_v9, %v360_v6  ;;  %v352_v16 = vld [vmem:[%s192_s22] sm:$0xf] }
  0x11   : > { %v365_v15 = vor.u32 %v373_v10, %v362_v11  ;;  %v372_v17 = vld [vmem:[%s192_s22 + $0x4] sm:$0xf0]  ;;  %v371_v18 = vld [vmem:[%s192_s22 + $0x4] sm:$0xf]  ;;  %v354_v19 = vld [vmem:[%s192_s22 + $0x8] sm:$0xf0] }
  0x12   : > { %v224_v7 = vpack.c.b16 %v218_v4, %v218_v4  ;;  %v225_v8 = vpack.c.b16 %v219_v5, %v219_v5  ;;  %v353_v20 = vor.u32 %v372_v17, %v352_v16  ;;  %v357_v21 = vor.u32 %v371_v18, %v354_v19 }
  0x14   : > { %v236_v12 = vsel %vm234_vm0, %v224_v7, 0  ;;  %v239_v13 = vsel %vm234_vm0, %v225_v8, 0 }
  0x15   : > { %278 = vperm.xlu0 %385, %v275_v3   ;;  %246 = vmatpush.bf16.msra.mxu0 %v236_v12 }
  0x16   : > { %259 = vmatpush.bf16.msra.mxu1 %v239_v13 }
  0x19   : > { %247 = vmatpush.bf16.msra.mxu0 %v361_v14 }
  0x1a   : > { %260 = vmatpush.bf16.msra.mxu1 %v365_v15 }
  0x1d   : > { %248 = vmatpush.bf16.msra.mxu0 %v353_v20 }
  0x1e   : > { %261 = vmatpush.bf16.msra.mxu1 %v357_v21 }
  0x20   : > { %366 = vmatmul.msk.bf16.vlgmr.msra.gmra.mxu0 %vm230_vm1, %v199_v22 }
  0x21   : > { %367 = vmatmul.msk.bf16.vlgmr.msra.gmra.mxu1 %vm230_vm1, %v199_v22 }
  0x7f   : > { %v271_v23 = vpop.permute.xlu0 %270 }
  0x87   : > { %v279_v28 = vpop.permute.xlu0 %278 }
  0x9d   : > { %v250_v24 = vpop.f32.mrf.mxu0 }
  0x9e   : > { %v263_v25 = vpop.f32.mrf.mxu1  ;;  %v273_v26 = vmul.f32 %v271_v23, %v250_v24 }
  0x9f   : > { %v274_v27 = vmul.f32 %v271_v23, %v263_v25 }
  0xa0   : > { %v281_v29 = vadd.f32 %v279_v28, %v273_v26 }
  0xa1   : > { %v282_v30 = vadd.f32 %v279_v28, %v274_v27 }
  0xa2   : > { %v283_v31 = vmax.f32 %v281_v29, 0.0 }
  0xa3   : > { %v284_v32 = vmax.f32 %v282_v30, 0.0 }
  0xa4   : > { %285 = vst [vmem:[%s197_s30] sm:$0xff] %v283_v31 }
  0xa5   : > { %286 = vst [vmem:[%s197_s30 + $0x8] sm:$0xff] %v284_v32  ;;  %v252_v33 = vpop.f32.mrf.mxu0 }
  0xa6   : > { %v265_v34 = vpop.f32.mrf.mxu1 }
  0xa7 PF: > { %s14_s15 = sadd.s32 1, %s392_s15  }
  0xa8   : > { %p11_p4 = scmp.ge.s32.totalorder %s14_s15, 4  }
  0xaa   :  { %13 = sbr.rel (!%p11_p4) target bundleno = 1 (0x1), region = 66 }

</bundles_post_ra>
